<compile_context>
chip_gen: v7x
topology: tpu7x:2x2x1
jax: 0.10.0
libtpu: 0.0.40
codegen_flags: <defaults>
</compile_context>

<pallas_src>
import jax
import jax.numpy as jnp
from jax import lax
from jax.experimental import pallas as pl
from jax.experimental.pallas import tpu as pltpu

LN_EPS = 1e-5


def _layernorm_cols(x, gamma, beta):
    """LayerNorm over the feature (sublane) axis of an (F, TILE_B) tile.

    Two-pass form (biased variance, eps = 1e-5, matching torch.nn.LayerNorm
    defaults); d = x - mu is reused for the normalize, so it costs the same
    as the fused E[x^2]-mu^2 form but is numerically tighter.
    gamma/beta are (F, 1) columns (broadcast over lanes).
    """
    mu = jnp.mean(x, axis=0, keepdims=True)          # (1, TB)
    d = x - mu
    var = jnp.mean(d * d, axis=0, keepdims=True)     # (1, TB)
    inv = lax.rsqrt(var + LN_EPS)
    return d * inv * gamma + beta


# Contract the LAST axis of both operands: W(H, K) . X(TB, K) -> (H, TB).
# The MXU absorbs the "transpose" of the batch-major activation tile.
_DN_LAST = (((1,), (1,)), ((), ()))


def critic_kernel(
    state_ref, action_ref,
    w1_ref, b1_ref, g1_ref, be1_ref,
    w2_ref, b2_ref, g2_ref, be2_ref,
    wa_ref, ba_ref,
    wq_ref, bq_ref,
    q_ref,
):
    st = state_ref[...]           # (TILE_B, n_states)   batch-major, f32
    act = action_ref[...]         # (TILE_B, n_actions)

    # fc1 -> LayerNorm -> ReLU                           (n_hid_1, TILE_B)
    h1 = lax.dot_general(w1_ref[...], st, _DN_LAST,
                         preferred_element_type=jnp.float32) + b1_ref[...]
    h1 = _layernorm_cols(h1, g1_ref[...], be1_ref[...])
    h1 = jnp.maximum(h1, 0.0)

    # fc2 -> LayerNorm                                   (n_hid_2, TILE_B)
    h2 = jnp.dot(w2_ref[...], h1,
                 preferred_element_type=jnp.float32) + b2_ref[...]
    state_val = _layernorm_cols(h2, g2_ref[...], be2_ref[...])

    # action_value branch on the MXU (K = n_actions is tiny, but the MXU /
    # vector-extended slot is nearly idle while the VALU is the bottleneck).
    action_val = lax.dot_general(wa_ref[...], act, _DN_LAST,
                                 preferred_element_type=jnp.float32) + ba_ref[...]

    # combine + ReLU, then q head on the VPU (sublane reduce -> lane-dense row)
    sa = jnp.maximum(state_val + action_val, 0.0)      # (n_hid_2, TILE_B)
    q = jnp.sum(sa * wq_ref[...], axis=0, keepdims=True) + bq_ref[0, 0]
    q_ref[...] = q.astype(q_ref.dtype)                 # (1, TILE_B), lane-dense


def _round_up(x, m):
    return (x + m - 1) // m * m


def _choose_tiling(batch, cap=4096, min_tile=128):
    """Pick (tile_b, num_tiles).

    * tile_b is a multiple of 128 (lane axis) and at most `cap`.
    * For tiny batches (<= 256 rows padded) use a single minimal tile.
    * Otherwise use an EVEN number of tiles so the parallel grid axis
      load-balances across v7x's two TensorCores, each tile <= cap.
    """
    b128 = _round_up(max(batch, 1), min_tile)
    if b128 <= 2 * min_tile:
        return b128, 1
    n = 2
    while _round_up(-(-batch // n), min_tile) > cap:
        n += 2
    tile = _round_up(-(-batch // n), min_tile)
    return tile, n


@jax.jit
def critic_forward(state, action, params):
    B, n_states = state.shape
    n_actions = action.shape[1]

    tile_b, num_tiles = _choose_tiling(B)
    b_pad = tile_b * num_tiles

    # Batch-major inputs; only the batch axis is zero-padded (cheap copy,
    # elided entirely when B already matches the tiling).  Padded rows are
    # per-column independent and their q values are sliced off at the end.
    state_p = jnp.pad(state.astype(jnp.float32), ((0, b_pad - B), (0, 0)))
    action_p = jnp.pad(action.astype(jnp.float32), ((0, b_pad - B), (0, 0)))

    def act_map(i):        # activation tiles advance along the batch axis
        return (i, 0)

    def out_map(i):        # (1, TILE_B) lane-dense output row
        return (0, i)

    def const_map(i):      # params stay VMEM-resident across grid steps
        return (0, 0)

    p = params
    param_args = (
        p["w1"], p["b1"], p["g1"], p["be1"],
        p["w2"], p["b2"], p["g2"], p["be2"],
        p["wa"], p["ba"], p["wq"],
    )

    in_specs = (
        [pl.BlockSpec((tile_b, n_states), act_map),
         pl.BlockSpec((tile_b, n_actions), act_map)]
        + [pl.BlockSpec(a.shape, const_map) for a in param_args]
        + [pl.BlockSpec(memory_space=pltpu.MemorySpace.SMEM)]   # bq scalar
    )

    q_row = pl.pallas_call(
        critic_kernel,
        out_shape=jax.ShapeDtypeStruct((1, b_pad), jnp.float32),
        grid=(num_tiles,),
        in_specs=in_specs,
        out_specs=pl.BlockSpec((1, tile_b), out_map),
        compiler_params=pltpu.CompilerParams(
            dimension_semantics=("parallel",),
        ),
    )(state_p, action_p, *param_args, p["bq"])

    return q_row[0, :B].reshape(B, 1)


def init_params(key, n_states, n_actions, n_hid_1, n_hid_2):
    """Deterministic init matching the torch module's init ranges.

    Weights are stored in torch layout (out, in); f = 1/sqrt(weight.size()[0])
    = 1/sqrt(out_features), exactly as in the original code.  Biases and
    LayerNorm affine params are stored as (out, 1) columns for the
    batch-on-lanes kernel layout.  The q head weight (torch shape (1, H2))
    is stored as its transpose, a (H2, 1) column; its bias is a (1, 1) scalar.
    """
    ks = jax.random.split(key, 8)
    f1 = 1.0 / (n_hid_1 ** 0.5)
    f2 = 1.0 / (n_hid_2 ** 0.5)
    f3 = 1.0 / (n_hid_2 ** 0.5)
    fq = 0.003

    def u(k, shape, lim):
        return jax.random.uniform(k, shape, jnp.float32, minval=-lim, maxval=lim)

    return {
        # fc1: n_states -> n_hid_1
        "w1": u(ks[0], (n_hid_1, n_states), f1),
        "b1": u(ks[1], (n_hid_1, 1), f1),
        "g1": jnp.ones((n_hid_1, 1), jnp.float32),
        "be1": jnp.zeros((n_hid_1, 1), jnp.float32),
        # fc2: n_hid_1 -> n_hid_2
        "w2": u(ks[2], (n_hid_2, n_hid_1), f2),
        "b2": u(ks[3], (n_hid_2, 1), f2),
        "g2": jnp.ones((n_hid_2, 1), jnp.float32),
        "be2": jnp.zeros((n_hid_2, 1), jnp.float32),
        # action_value: n_actions -> n_hid_2
        "wa": u(ks[4], (n_hid_2, n_actions), f3),
        "ba": u(ks[5], (n_hid_2, 1), f3),
        # q head: n_hid_2 -> 1
        "wq": u(ks[6], (n_hid_2, 1), fq),
        "bq": u(ks[7], (1, 1), fq),
    }


def reference_forward(state, action, p):
    """Pure-JAX reference (batch-major, two-pass LayerNorm) for checking."""
    def ln(x, g, b):
        mu = jnp.mean(x, axis=-1, keepdims=True)
        var = jnp.mean((x - mu) * (x - mu), axis=-1, keepdims=True)
        return (x - mu) * lax.rsqrt(var + LN_EPS) * g.T + b.T

    h1 = state @ p["w1"].T + p["b1"].T
    h1 = jnp.maximum(ln(h1, p["g1"], p["be1"]), 0.0)
    h2 = h1 @ p["w2"].T + p["b2"].T
    sv = ln(h2, p["g2"], p["be2"])
    av = action @ p["wa"].T + p["ba"].T
    sa = jnp.maximum(sv + av, 0.0)
    return sa @ p["wq"] + p["bq"]


if __name__ == "__main__":
    # Small DDPG-critic-style shapes.
    n_states, n_actions, n_hid_1, n_hid_2 = 16, 4, 64, 32

    key = jax.random.PRNGKey(0)
    k_state, k_action, k_params = jax.random.split(key, 3)
    params = init_params(k_params, n_states, n_actions, n_hid_1, n_hid_2)

    # Small batch (single 128-wide grid step, padded batch rows).
    B = 2
    state = jax.random.normal(k_state, (B, n_states), jnp.float32)
    action = jax.random.normal(k_action, (B, n_actions), jnp.float32)

    q = jax.block_until_ready(critic_forward(state, action, params))
    q_ref = reference_forward(state, action, params)
    assert q.shape == (B, 1), q.shape
    assert jnp.allclose(q, q_ref, atol=2e-5, rtol=2e-5), (q, q_ref)

    # Larger batch exercising multiple (even-count) grid steps + tail padding.
    B2 = 2500
    state2 = jax.random.normal(k_state, (B2, n_states), jnp.float32)
    action2 = jax.random.normal(k_action, (B2, n_actions), jnp.float32)
    q2 = jax.block_until_ready(critic_forward(state2, action2, params))
    q2_ref = reference_forward(state2, action2, params)
    assert q2.shape == (B2, 1), q2.shape
    assert jnp.allclose(q2, q2_ref, atol=2e-5, rtol=2e-5)

    print("KERNEL_OK")
</pallas_src>

<mosaic_0001>
module attributes {stable_mosaic.version = 11 : i64} {
  func.func @critic_kernel(%arg0: i32, %arg1: memref<128x16xf32, #tpu.memory_space<vmem>>, %arg2: memref<128x4xf32, #tpu.memory_space<vmem>>, %arg3: memref<64x16xf32, #tpu.memory_space<vmem>>, %arg4: memref<64x1xf32, #tpu.memory_space<vmem>>, %arg5: memref<64x1xf32, #tpu.memory_space<vmem>>, %arg6: memref<64x1xf32, #tpu.memory_space<vmem>>, %arg7: memref<32x64xf32, #tpu.memory_space<vmem>>, %arg8: memref<32x1xf32, #tpu.memory_space<vmem>>, %arg9: memref<32x1xf32, #tpu.memory_space<vmem>>, %arg10: memref<32x1xf32, #tpu.memory_space<vmem>>, %arg11: memref<32x4xf32, #tpu.memory_space<vmem>>, %arg12: memref<32x1xf32, #tpu.memory_space<vmem>>, %arg13: memref<32x1xf32, #tpu.memory_space<vmem>>, %arg14: memref<1x1xf32, #tpu.memory_space<smem>>, %arg15: memref<1x128xf32, #tpu.memory_space<vmem>>) attributes {dimension_semantics = [#tpu.dimension_semantics<parallel>], iteration_bounds = array<i64: 1>, scalar_prefetch = 0 : i64, scratch_operands = 0 : i64, tpu.core_type = #tpu.core_type<tc>, window_params = [{transform_indices = @transform_0, window_bounds = array<i64: 128, 16>}, {transform_indices = @transform_1, window_bounds = array<i64: 128, 4>}, {pipeline_mode = #tpu.pipeline_mode<synchronous>, transform_indices = @transform_2, window_bounds = array<i64: 64, 16>}, {pipeline_mode = #tpu.pipeline_mode<synchronous>, transform_indices = @transform_3, window_bounds = array<i64: 64, 1>}, {pipeline_mode = #tpu.pipeline_mode<synchronous>, transform_indices = @transform_4, window_bounds = array<i64: 64, 1>}, {pipeline_mode = #tpu.pipeline_mode<synchronous>, transform_indices = @transform_5, window_bounds = array<i64: 64, 1>}, {pipeline_mode = #tpu.pipeline_mode<synchronous>, transform_indices = @transform_6, window_bounds = array<i64: 32, 64>}, {pipeline_mode = #tpu.pipeline_mode<synchronous>, transform_indices = @transform_7, window_bounds = array<i64: 32, 1>}, {pipeline_mode = #tpu.pipeline_mode<synchronous>, transform_indices = @transform_8, window_bounds = array<i64: 32, 1>}, {pipeline_mode = #tpu.pipeline_mode<synchronous>, transform_indices = @transform_9, window_bounds = array<i64: 32, 1>}, {pipeline_mode = #tpu.pipeline_mode<synchronous>, transform_indices = @transform_10, window_bounds = array<i64: 32, 4>}, {pipeline_mode = #tpu.pipeline_mode<synchronous>, transform_indices = @transform_11, window_bounds = array<i64: 32, 1>}, {pipeline_mode = #tpu.pipeline_mode<synchronous>, transform_indices = @transform_12, window_bounds = array<i64: 32, 1>}, {transform_indices = @transform_13, window_bounds = array<i64: 1, 1>}, {transform_indices = @transform_14, window_bounds = array<i64: 1, 128>}]} {
    %c0 = arith.constant 0 : index
    %c0_0 = arith.constant 0 : index
    %0 = vector.load %arg1[%c0, %c0_0] : memref<128x16xf32, #tpu.memory_space<vmem>>, vector<128x16xf32>
    %c0_1 = arith.constant 0 : index
    %c0_2 = arith.constant 0 : index
    %1 = vector.load %arg2[%c0_1, %c0_2] : memref<128x4xf32, #tpu.memory_space<vmem>>, vector<128x4xf32>
    %c0_3 = arith.constant 0 : index
    %c0_4 = arith.constant 0 : index
    %2 = vector.load %arg3[%c0_3, %c0_4] : memref<64x16xf32, #tpu.memory_space<vmem>>, vector<64x16xf32>
    %cst = arith.constant dense<0.000000e+00> : vector<64x128xf32>
    %3 = tpu.matmul %2, %0, %cst {dimension_numbers = #tpu.dot_dimension_numbers<[1], [1], [0], [0], [0, 0, 1, 0], [], []>} : vector<64x16xf32>, vector<128x16xf32>, vector<64x128xf32> -> vector<64x128xf32>
    %c0_5 = arith.constant 0 : index
    %c0_6 = arith.constant 0 : index
    %4 = vector.load %arg4[%c0_5, %c0_6] : memref<64x1xf32, #tpu.memory_space<vmem>>, vector<64x1xf32>
    %5 = vector.broadcast %4 : vector<64x1xf32> to vector<64x128xf32>
    %6 = arith.addf %3, %5 : vector<64x128xf32>
    %c0_7 = arith.constant 0 : index
    %c0_8 = arith.constant 0 : index
    %7 = vector.load %arg5[%c0_7, %c0_8] : memref<64x1xf32, #tpu.memory_space<vmem>>, vector<64x1xf32>
    %c0_9 = arith.constant 0 : index
    %c0_10 = arith.constant 0 : index
    %8 = vector.load %arg6[%c0_9, %c0_10] : memref<64x1xf32, #tpu.memory_space<vmem>>, vector<64x1xf32>
    %cst_11 = arith.constant dense<0.000000e+00> : vector<128xf32>
    %9 = vector.multi_reduction <add>, %6, %cst_11 [0] : vector<64x128xf32> to vector<128xf32>
    %10 = vector.shape_cast %9 : vector<128xf32> to vector<1x128xf32>
    %cst_12 = arith.constant 6.400000e+01 : f32
    %11 = vector.broadcast %cst_12 : f32 to vector<1x128xf32>
    %12 = arith.divf %10, %11 : vector<1x128xf32>
    %13 = vector.broadcast %12 : vector<1x128xf32> to vector<64x128xf32>
    %14 = arith.subf %6, %13 : vector<64x128xf32>
    %15 = arith.mulf %14, %14 : vector<64x128xf32>
    %cst_13 = arith.constant dense<0.000000e+00> : vector<128xf32>
    %16 = vector.multi_reduction <add>, %15, %cst_13 [0] : vector<64x128xf32> to vector<128xf32>
    %17 = vector.shape_cast %16 : vector<128xf32> to vector<1x128xf32>
    %cst_14 = arith.constant 6.400000e+01 : f32
    %18 = vector.broadcast %cst_14 : f32 to vector<1x128xf32>
    %19 = arith.divf %17, %18 : vector<1x128xf32>
    %cst_15 = arith.constant 9.99999974E-6 : f32
    %20 = vector.broadcast %cst_15 : f32 to vector<1x128xf32>
    %21 = arith.addf %19, %20 : vector<1x128xf32>
    %22 = math.rsqrt %21 : vector<1x128xf32>
    %23 = vector.broadcast %22 : vector<1x128xf32> to vector<64x128xf32>
    %24 = arith.mulf %14, %23 : vector<64x128xf32>
    %25 = vector.broadcast %7 : vector<64x1xf32> to vector<64x128xf32>
    %26 = arith.mulf %24, %25 : vector<64x128xf32>
    %27 = vector.broadcast %8 : vector<64x1xf32> to vector<64x128xf32>
    %28 = arith.addf %26, %27 : vector<64x128xf32>
    %cst_16 = arith.constant 0.000000e+00 : f32
    %29 = vector.broadcast %cst_16 : f32 to vector<64x128xf32>
    %30 = arith.maximumf %28, %29 : vector<64x128xf32>
    %c0_17 = arith.constant 0 : index
    %c0_18 = arith.constant 0 : index
    %31 = vector.load %arg7[%c0_17, %c0_18] : memref<32x64xf32, #tpu.memory_space<vmem>>, vector<32x64xf32>
    %cst_19 = arith.constant dense<0.000000e+00> : vector<32x128xf32>
    %32 = tpu.matmul %31, %30, %cst_19 {dimension_numbers = #tpu.dot_dimension_numbers<[1], [0], [0], [1], [0, 0, 1, 1], [], []>} : vector<32x64xf32>, vector<64x128xf32>, vector<32x128xf32> -> vector<32x128xf32>
    %c0_20 = arith.constant 0 : index
    %c0_21 = arith.constant 0 : index
    %33 = vector.load %arg8[%c0_20, %c0_21] : memref<32x1xf32, #tpu.memory_space<vmem>>, vector<32x1xf32>
    %34 = vector.broadcast %33 : vector<32x1xf32> to vector<32x128xf32>
    %35 = arith.addf %32, %34 : vector<32x128xf32>
    %c0_22 = arith.constant 0 : index
    %c0_23 = arith.constant 0 : index
    %36 = vector.load %arg9[%c0_22, %c0_23] : memref<32x1xf32, #tpu.memory_space<vmem>>, vector<32x1xf32>
    %c0_24 = arith.constant 0 : index
    %c0_25 = arith.constant 0 : index
    %37 = vector.load %arg10[%c0_24, %c0_25] : memref<32x1xf32, #tpu.memory_space<vmem>>, vector<32x1xf32>
    %cst_26 = arith.constant dense<0.000000e+00> : vector<128xf32>
    %38 = vector.multi_reduction <add>, %35, %cst_26 [0] : vector<32x128xf32> to vector<128xf32>
    %39 = vector.shape_cast %38 : vector<128xf32> to vector<1x128xf32>
    %cst_27 = arith.constant 3.200000e+01 : f32
    %40 = vector.broadcast %cst_27 : f32 to vector<1x128xf32>
    %41 = arith.divf %39, %40 : vector<1x128xf32>
    %42 = vector.broadcast %41 : vector<1x128xf32> to vector<32x128xf32>
    %43 = arith.subf %35, %42 : vector<32x128xf32>
    %44 = arith.mulf %43, %43 : vector<32x128xf32>
    %cst_28 = arith.constant dense<0.000000e+00> : vector<128xf32>
    %45 = vector.multi_reduction <add>, %44, %cst_28 [0] : vector<32x128xf32> to vector<128xf32>
    %46 = vector.shape_cast %45 : vector<128xf32> to vector<1x128xf32>
    %cst_29 = arith.constant 3.200000e+01 : f32
    %47 = vector.broadcast %cst_29 : f32 to vector<1x128xf32>
    %48 = arith.divf %46, %47 : vector<1x128xf32>
    %cst_30 = arith.constant 9.99999974E-6 : f32
    %49 = vector.broadcast %cst_30 : f32 to vector<1x128xf32>
    %50 = arith.addf %48, %49 : vector<1x128xf32>
    %51 = math.rsqrt %50 : vector<1x128xf32>
    %52 = vector.broadcast %51 : vector<1x128xf32> to vector<32x128xf32>
    %53 = arith.mulf %43, %52 : vector<32x128xf32>
    %54 = vector.broadcast %36 : vector<32x1xf32> to vector<32x128xf32>
    %55 = arith.mulf %53, %54 : vector<32x128xf32>
    %56 = vector.broadcast %37 : vector<32x1xf32> to vector<32x128xf32>
    %57 = arith.addf %55, %56 : vector<32x128xf32>
    %c0_31 = arith.constant 0 : index
    %c0_32 = arith.constant 0 : index
    %58 = vector.load %arg11[%c0_31, %c0_32] : memref<32x4xf32, #tpu.memory_space<vmem>>, vector<32x4xf32>
    %cst_33 = arith.constant dense<0.000000e+00> : vector<32x128xf32>
    %59 = tpu.matmul %58, %1, %cst_33 {dimension_numbers = #tpu.dot_dimension_numbers<[1], [1], [0], [0], [0, 0, 1, 0], [], []>} : vector<32x4xf32>, vector<128x4xf32>, vector<32x128xf32> -> vector<32x128xf32>
    %c0_34 = arith.constant 0 : index
    %c0_35 = arith.constant 0 : index
    %60 = vector.load %arg12[%c0_34, %c0_35] : memref<32x1xf32, #tpu.memory_space<vmem>>, vector<32x1xf32>
    %61 = vector.broadcast %60 : vector<32x1xf32> to vector<32x128xf32>
    %62 = arith.addf %59, %61 : vector<32x128xf32>
    %63 = arith.addf %57, %62 : vector<32x128xf32>
    %cst_36 = arith.constant 0.000000e+00 : f32
    %64 = vector.broadcast %cst_36 : f32 to vector<32x128xf32>
    %65 = arith.maximumf %63, %64 : vector<32x128xf32>
    %c0_37 = arith.constant 0 : index
    %c0_38 = arith.constant 0 : index
    %66 = vector.load %arg13[%c0_37, %c0_38] : memref<32x1xf32, #tpu.memory_space<vmem>>, vector<32x1xf32>
    %67 = vector.broadcast %66 : vector<32x1xf32> to vector<32x128xf32>
    %68 = arith.mulf %65, %67 : vector<32x128xf32>
    %cst_39 = arith.constant dense<0.000000e+00> : vector<128xf32>
    %69 = vector.multi_reduction <add>, %68, %cst_39 [0] : vector<32x128xf32> to vector<128xf32>
    %70 = vector.shape_cast %69 : vector<128xf32> to vector<1x128xf32>
    %c0_40 = arith.constant 0 : index
    %c0_41 = arith.constant 0 : index
    %71 = memref.load %arg14[%c0_40, %c0_41] : memref<1x1xf32, #tpu.memory_space<smem>>
    %72 = vector.broadcast %71 : f32 to vector<1x128xf32>
    %73 = arith.addf %70, %72 : vector<1x128xf32>
    %c0_42 = arith.constant 0 : index
    %c0_43 = arith.constant 0 : index
    %74 = vector.load %arg15[%c0_42, %c0_43] : memref<1x128xf32, #tpu.memory_space<vmem>>, vector<1x128xf32>
    tpu.vector_store %arg15[%c0_42, %c0_43], %73 {strides = array<i32>} : memref<1x128xf32, #tpu.memory_space<vmem>>, vector<1x128xf32>,
    return
  }
  func.func @transform_0(%arg0: i32) -> (i32, i32) {
    %c0_i32 = arith.constant 0 : i32
    %c0_i32_0 = arith.constant 0 : i32
    return %arg0, %c0_i32 : i32, i32
  }
  func.func @transform_1(%arg0: i32) -> (i32, i32) {
    %c0_i32 = arith.constant 0 : i32
    %c0_i32_0 = arith.constant 0 : i32
    return %arg0, %c0_i32 : i32, i32
  }
  func.func @transform_2(%arg0: i32) -> (i32, i32) {
    %c0_i32 = arith.constant 0 : i32
    %c0_i32_0 = arith.constant 0 : i32
    %c0_i32_1 = arith.constant 0 : i32
    return %c0_i32, %c0_i32_0 : i32, i32
  }
  func.func @transform_3(%arg0: i32) -> (i32, i32) {
    %c0_i32 = arith.constant 0 : i32
    %c0_i32_0 = arith.constant 0 : i32
    %c0_i32_1 = arith.constant 0 : i32
    return %c0_i32, %c0_i32_0 : i32, i32
  }
  func.func @transform_4(%arg0: i32) -> (i32, i32) {
    %c0_i32 = arith.constant 0 : i32
    %c0_i32_0 = arith.constant 0 : i32
    %c0_i32_1 = arith.constant 0 : i32
    return %c0_i32, %c0_i32_0 : i32, i32
  }
  func.func @transform_5(%arg0: i32) -> (i32, i32) {
    %c0_i32 = arith.constant 0 : i32
    %c0_i32_0 = arith.constant 0 : i32
    %c0_i32_1 = arith.constant 0 : i32
    return %c0_i32, %c0_i32_0 : i32, i32
  }
  func.func @transform_6(%arg0: i32) -> (i32, i32) {
    %c0_i32 = arith.constant 0 : i32
    %c0_i32_0 = arith.constant 0 : i32
    %c0_i32_1 = arith.constant 0 : i32
    return %c0_i32, %c0_i32_0 : i32, i32
  }
  func.func @transform_7(%arg0: i32) -> (i32, i32) {
    %c0_i32 = arith.constant 0 : i32
    %c0_i32_0 = arith.constant 0 : i32
    %c0_i32_1 = arith.constant 0 : i32
    return %c0_i32, %c0_i32_0 : i32, i32
  }
  func.func @transform_8(%arg0: i32) -> (i32, i32) {
    %c0_i32 = arith.constant 0 : i32
    %c0_i32_0 = arith.constant 0 : i32
    %c0_i32_1 = arith.constant 0 : i32
    return %c0_i32, %c0_i32_0 : i32, i32
  }
  func.func @transform_9(%arg0: i32) -> (i32, i32) {
    %c0_i32 = arith.constant 0 : i32
    %c0_i32_0 = arith.constant 0 : i32
    %c0_i32_1 = arith.constant 0 : i32
    return %c0_i32, %c0_i32_0 : i32, i32
  }
  func.func @transform_10(%arg0: i32) -> (i32, i32) {
    %c0_i32 = arith.constant 0 : i32
    %c0_i32_0 = arith.constant 0 : i32
    %c0_i32_1 = arith.constant 0 : i32
    return %c0_i32, %c0_i32_0 : i32, i32
  }
  func.func @transform_11(%arg0: i32) -> (i32, i32) {
    %c0_i32 = arith.constant 0 : i32
    %c0_i32_0 = arith.constant 0 : i32
    %c0_i32_1 = arith.constant 0 : i32
    return %c0_i32, %c0_i32_0 : i32, i32
  }
  func.func @transform_12(%arg0: i32) -> (i32, i32) {
    %c0_i32 = arith.constant 0 : i32
    %c0_i32_0 = arith.constant 0 : i32
    %c0_i32_1 = arith.constant 0 : i32
    return %c0_i32, %c0_i32_0 : i32, i32
  }
  func.func @transform_13(%arg0: i32) -> (i32, i32) {
    %c0_i32 = arith.constant 0 : i32
    %c0_i32_0 = arith.constant 0 : i32
    %c0_i32_1 = arith.constant 0 : i32
    return %c0_i32, %c0_i32_0 : i32, i32
  }
  func.func @transform_14(%arg0: i32) -> (i32, i32) {
    %c0_i32 = arith.constant 0 : i32
    %c0_i32_0 = arith.constant 0 : i32
    return %c0_i32, %arg0 : i32, i32
  }
}

</mosaic_0001>

<bundles_post_ra>
// kernel: critic_forward.1
= control target key start
LH: loop header
LB: loop body
LE: loop exit
PB: predicated region body
PF: predicated region fallthrough
CT: control target
= control target key end

     0   :  { %vm136_vm0 = vcmask 130048   ;;  %v1260_v3 = vmov 0   ;;  %vm517_vm2 = vcmask 523264   ;;  %vm734_vm3 = vcmask 31744   ;;  %s1710_s0 = inlined_call_operand.vmem [shape: f32[128,16], index: 0, kind: input, shape index: {}]   ;;  %s1711_s3 = inlined_call_operand.vmem [shape: f32[64,1], index: 3, kind: input, shape index: {}]   ;;  %s1712_s2 = inlined_call_operand.vmem [shape: f32[64,16], index: 2, kind: input, shape index: {}]   ;;  %s1713_s4 = inlined_call_operand.vmem [shape: f32[64,1], index: 4, kind: input, shape index: {}]   ;;  %s1714_s5 = inlined_call_operand.vmem [shape: f32[64,1], index: 5, kind: input, shape index: {}]   ;;  %s1715_s7 = inlined_call_operand.vmem [shape: f32[32,1], index: 7, kind: input, shape index: {}]   ;;  %s1716_s8 = inlined_call_operand.vmem [shape: f32[32,1], index: 8, kind: input, shape index: {}]   ;;  %s1717_s9 = inlined_call_operand.vmem [shape: f32[32,1], index: 9, kind: input, shape index: {}]   ;;  %s1718_s11 = inlined_call_operand.vmem [shape: f32[32,1], index: 11, kind: input, shape index: {}]   ;;  %s1719_s12 = inlined_call_operand.vmem [shape: f32[32,1], index: 12, kind: input, shape index: {}]   ;;  %s1720_s6 = inlined_call_operand.vmem [shape: f32[32,64], index: 6, kind: input, shape index: {}]   ;;  %s1721_s1 = inlined_call_operand.vmem [shape: f32[128,4], index: 1, kind: input, shape index: {}]   ;;  %s1722_s10 = inlined_call_operand.vmem [shape: f32[32,4], index: 10, kind: input, shape index: {}]   ;;  %s1723_s13 = inlined_call_operand.<no memory space> [shape: f32[1,1], index: 13, kind: input, shape index: {}]   ;;  %s1724_s14 = inlined_call_operand.vmem [shape: f32[1,128], index: 14, kind: output, shape index: {}]  }
   0x1   :  { %v48_v0 = vld [vmem:[%s1710_s0] sm:$0xff]  ;;  %v49_v1 = vld [vmem:[%s1710_s0 + $0x8] sm:$0xff]  ;;  %vm1344_vm1 = vmpackc.low %vm136_vm0, %vm136_vm0  ;;  %1254 = vset.pattern.permute.xlu0 %v1260_v3  ;;  %1255 = vset.pattern.permute.xlu1 %v1260_v3 }
   0x2   :  { %v1141_v4 = vpack.c.bf16 %v49_v1, %v48_v0  ;;  %v50_v5 = vld [vmem:[%s1710_s0 + $0x10] sm:$0xff]  ;;  %v51_v6 = vld [vmem:[%s1710_s0 + $0x18] sm:$0xff]  ;;  %v52_v8 = vld [vmem:[%s1710_s0 + $0x20] sm:$0xff] }
   0x3   :  { %v1147_v7 = vpack.c.bf16 %v51_v6, %v50_v5  ;;  %v88_v9 = vld [vmem:[%s1711_s3] sm:$0xff]  ;;  %v53_v10 = vld [vmem:[%s1710_s0 + $0x28] sm:$0xff]  ;;  %v90_v12 = vld [vmem:[%s1711_s3 + $0x10] sm:$0xff] }
   0x4   :  { %1143 = vmatprep.subr.msk.bf16.mxu0 %vm1344_vm1, %v1141_v4  ;;  %98 = vperm.xlu0 %1254, %v88_v9   ;;  %v80_v11 = vld [vmem:[%s1712_s2] sm:$0xff]  ;;  %v89_v13 = vld [vmem:[%s1711_s3 + $0x8] sm:$0xff]  ;;  %v91_v14 = vld [vmem:[%s1711_s3 + $0x18] sm:$0xff]  ;;  %v1153_v15 = vpack.c.bf16 %v53_v10, %v52_v8 }
   0x5   :  { %1146 = vmatpush3.bf16.xpose.msk.msra.mxu0 %vm1344_vm1, %v1141_v4  ;;  %1069 = vmatprep.mubr.msk.f32.mxu0 %vm136_vm0, %v80_v11  ;;  %v92_v16 = vld [vmem:[%s1711_s3 + $0x20] sm:$0xff]  ;;  %v93_v17 = vld [vmem:[%s1711_s3 + $0x28] sm:$0xff]  ;;  %v54_v18 = vld [vmem:[%s1710_s0 + $0x30] sm:$0xff] }
   0x6   :  { %1149 = vmatprep.subr.msk.bf16.mxu0 %vm1344_vm1, %v1147_v7  ;;  %108 = vperm.xlu1 %1255, %v90_v12   ;;  %v55_v19 = vld [vmem:[%s1710_s0 + $0x38] sm:$0xff]  ;;  %v94_v20 = vld [vmem:[%s1711_s3 + $0x30] sm:$0xff]  ;;  %v314_v23 = vld [vmem:[%s1713_s4] sm:$0xff] }
   0x7   :  { %v95_v21 = vld [vmem:[%s1711_s3 + $0x38] sm:$0xff]  ;;  %v1159_v22 = vpack.c.bf16 %v55_v19, %v54_v18  ;;  %v315_v24 = vld [vmem:[%s1713_s4 + $0x8] sm:$0xff]  ;;  %v56_v25 = vld [vmem:[%s1710_s0 + $0x40] sm:$0xff] }
   0x8   :  { %103 = vperm.xlu0 %1254, %v89_v13   ;;  %v57_v26 = vld [vmem:[%s1710_s0 + $0x48] sm:$0xff]  ;;  %v322_v27 = vld [vmem:[%s1714_s5] sm:$0xff]  ;;  %v316_v30 = vld [vmem:[%s1713_s4 + $0x10] sm:$0xff] }
   0x9   :  { %v323_v28 = vld [vmem:[%s1714_s5 + $0x8] sm:$0xff]  ;;  %v1165_v29 = vpack.c.bf16 %v57_v26, %v56_v25  ;;  %v317_v31 = vld [vmem:[%s1713_s4 + $0x18] sm:$0xff]  ;;  %v58_v32 = vld [vmem:[%s1710_s0 + $0x50] sm:$0xff] }
   0xa   :  { %113 = vperm.xlu1 %1255, %v91_v14   ;;  %v59_v33 = vld [vmem:[%s1710_s0 + $0x58] sm:$0xff]  ;;  %v324_v34 = vld [vmem:[%s1714_s5 + $0x10] sm:$0xff]  ;;  %v318_v37 = vld [vmem:[%s1713_s4 + $0x20] sm:$0xff] }
   0xb   :  { %v325_v35 = vld [vmem:[%s1714_s5 + $0x18] sm:$0xff]  ;;  %v1171_v36 = vpack.c.bf16 %v59_v33, %v58_v32  ;;  %v319_v38 = vld [vmem:[%s1713_s4 + $0x28] sm:$0xff]  ;;  %v60_v39 = vld [vmem:[%s1710_s0 + $0x60] sm:$0xff] }
   0xc   :  { %118 = vperm.xlu0 %1254, %v92_v16   ;;  %v61_v40 = vld [vmem:[%s1710_s0 + $0x68] sm:$0xff]  ;;  %v326_v41 = vld [vmem:[%s1714_s5 + $0x20] sm:$0xff]  ;;  %v320_v44 = vld [vmem:[%s1713_s4 + $0x30] sm:$0xff] }
   0xd   :  { %1152 = vmatpush3.bf16.xpose.msk.msra.mxu0 %vm1344_vm1, %v1147_v7  ;;  %v327_v42 = vld [vmem:[%s1714_s5 + $0x28] sm:$0xff]  ;;  %v1177_v43 = vpack.c.bf16 %v61_v40, %v60_v39  ;;  %v321_v45 = vld [vmem:[%s1713_s4 + $0x38] sm:$0xff]  ;;  %v62_v46 = vld [vmem:[%s1710_s0 + $0x70] sm:$0xff] }
   0xe   :  { %1155 = vmatprep.subr.msk.bf16.mxu0 %vm1344_vm1, %v1153_v15  ;;  %123 = vperm.xlu1 %1255, %v93_v17   ;;  %v63_v47 = vld [vmem:[%s1710_s0 + $0x78] sm:$0xff]  ;;  %v328_v48 = vld [vmem:[%s1714_s5 + $0x30] sm:$0xff]  ;;  %v493_v51 = vld [vmem:[%s1715_s7] sm:$0xff] }
   0xf   :  { %v329_v49 = vld [vmem:[%s1714_s5 + $0x38] sm:$0xff]  ;;  %v1183_v50 = vpack.c.bf16 %v63_v47, %v62_v46  ;;  %v494_v52 = vld [vmem:[%s1715_s7 + $0x8] sm:$0xff]  ;;  %v495_v53 = vld [vmem:[%s1715_s7 + $0x10] sm:$0xff] }
  0x10   :  { %128 = vperm.xlu0 %1254, %v94_v20   ;;  %v496_v54 = vld [vmem:[%s1715_s7 + $0x18] sm:$0xff]  ;;  %v615_v55 = vld [vmem:[%s1716_s8] sm:$0xff]  ;;  %v616_v56 = vld [vmem:[%s1716_s8 + $0x8] sm:$0xff] }
  0x11   :  { %v617_v57 = vld [vmem:[%s1716_s8 + $0x10] sm:$0xff]  ;;  %v81_v58 = vld [vmem:[%s1712_s2 + $0x8] sm:$0xff]  ;;  %v619_v59 = vld [vmem:[%s1717_s9] sm:$0xff] }
  0x12   :  { %133 = vperm.xlu1 %1255, %v95_v21   ;;  %v82_v60 = vld [vmem:[%s1712_s2 + $0x10] sm:$0xff]  ;;  %v620_v61 = vld [vmem:[%s1717_s9 + $0x8] sm:$0xff]  ;;  %v83_v62 = vld [vmem:[%s1712_s2 + $0x18] sm:$0xff] }
  0x13   :  { %v710_v63 = vld [vmem:[%s1718_s11] sm:$0xff]  ;;  %v711_v1 = vld [vmem:[%s1718_s11 + $0x8] sm:$0xff]  ;;  %v618_v3 = vld [vmem:[%s1716_s8 + $0x18] sm:$0xff] }
  0x14   :  { %387 = vperm.xlu0 %1254, %v314_v23   ;;  %v84_v0 = vld [vmem:[%s1712_s2 + $0x20] sm:$0xff]  ;;  %v85_v2 = vld [vmem:[%s1712_s2 + $0x28] sm:$0xff]  ;;  %v86_v4 = vld [vmem:[%s1712_s2 + $0x30] sm:$0xff] }
  0x15   :  { %1158 = vmatpush3.bf16.xpose.msk.msra.mxu0 %vm1344_vm1, %v1153_v15  ;;  %v621_v5 = vld [vmem:[%s1717_s9 + $0x10] sm:$0xff]  ;;  %v87_v6 = vld [vmem:[%s1712_s2 + $0x38] sm:$0xff]  ;;  %v888_v10 = vld [vmem:[%s1719_s12] sm:$0xff] }
  0x16   :  { %1161 = vmatprep.subr.msk.bf16.mxu0 %vm1344_vm1, %v1159_v22  ;;  %392 = vperm.xlu1 %1255, %v315_v24   ;;  %v712_v7 = vld [vmem:[%s1718_s11 + $0x10] sm:$0xff]  ;;  %v622_v8 = vld [vmem:[%s1717_s9 + $0x18] sm:$0xff]  ;;  %v889_v11 = vld [vmem:[%s1719_s12 + $0x8] sm:$0xff] }
  0x17   :  { %v713_v9 = vld [vmem:[%s1718_s11 + $0x18] sm:$0xff]  ;;  %v890_v12 = vld [vmem:[%s1719_s12 + $0x10] sm:$0xff]  ;;  %v489_v14 = vld [vmem:[%s1720_s6] sm:$0xff] }
  0x18   :  { %435 = vperm.xlu0 %1254, %v322_v27   ;;  %v891_v13 = vld [vmem:[%s1719_s12 + $0x18] sm:$0xff]  ;;  %1097 = vmatprep.mubr.msk.f32.mxu1 %vm517_vm2, %v489_v14  ;;  %vm1598_vm4 = vmpackc.low %vm734_vm3, %vm734_vm3 }
  0x1a   :  { %440 = vperm.xlu1 %1255, %v323_v28  }
  0x1c   :  { %397 = vperm.xlu0 %1254, %v316_v30  }
  0x1d   :  { %1164 = vmatpush3.bf16.xpose.msk.msra.mxu0 %vm1344_vm1, %v1159_v22 }
  0x1e   :  { %1167 = vmatprep.subr.msk.bf16.mxu0 %vm1344_vm1, %v1165_v29  ;;  %402 = vperm.xlu1 %1255, %v317_v31  }
  0x20   :  { %445 = vperm.xlu0 %1254, %v324_v34  }
  0x22   :  { %450 = vperm.xlu1 %1255, %v325_v35  }
  0x24   :  { %407 = vperm.xlu0 %1254, %v318_v37  }
  0x25   :  { %1170 = vmatpush3.bf16.xpose.msk.msra.mxu0 %vm1344_vm1, %v1165_v29 }
  0x26   :  { %1173 = vmatprep.subr.msk.bf16.mxu0 %vm1344_vm1, %v1171_v36  ;;  %412 = vperm.xlu1 %1255, %v319_v38  }
  0x28   :  { %455 = vperm.xlu0 %1254, %v326_v41  }
  0x2a   :  { %460 = vperm.xlu1 %1255, %v327_v42  }
  0x2c   :  { %417 = vperm.xlu0 %1254, %v320_v44  }
  0x2d   :  { %1176 = vmatpush3.bf16.xpose.msk.msra.mxu0 %vm1344_vm1, %v1171_v36 }
  0x2e   :  { %1179 = vmatprep.subr.msk.bf16.mxu0 %vm1344_vm1, %v1177_v43  ;;  %422 = vperm.xlu1 %1255, %v321_v45  }
  0x30   :  { %465 = vperm.xlu0 %1254, %v328_v48  }
  0x32   :  { %470 = vperm.xlu1 %1255, %v329_v49  }
  0x34   :  { %499 = vperm.xlu0 %1254, %v493_v51  }
  0x35   :  { %1182 = vmatpush3.bf16.xpose.msk.msra.mxu0 %vm1344_vm1, %v1177_v43 }
  0x36   :  { %1185 = vmatprep.subr.msk.bf16.mxu0 %vm1344_vm1, %v1183_v50  ;;  %504 = vperm.xlu1 %1255, %v494_v52  }
  0x38   :  { %509 = vperm.xlu0 %1254, %v495_v53  }
  0x3a   :  { %514 = vperm.xlu1 %1255, %v496_v54  }
  0x3c   :  { %660 = vperm.xlu0 %1254, %v615_v55  }
  0x3d   :  { %1188 = vmatpush3.bf16.xpose.msk.msra.mxu0 %vm1344_vm1, %v1183_v50 }
  0x3e   :  { %665 = vperm.xlu1 %1255, %v616_v56  }
  0x40   :  { %670 = vperm.xlu0 %1254, %v617_v57  }
  0x42   :  { %684 = vperm.xlu1 %1255, %v619_v59  }
  0x44   :  { %1070 = vmatmul.mubr.msk.f32.vlgmr.msra.gmra.mrb[0].mxu0 %vm136_vm0, %v81_v58  ;;  %689 = vperm.xlu0 %1254, %v620_v61  }
  0x45   :  { %1072 = vmatprep.mubr.msk.f32.mxu0 %vm136_vm0, %v82_v60 }
  0x46   :  { %716 = vperm.xlu1 %1255, %v710_v63  }
  0x48   :  { %1073 = vmatmul.mubr.msk.f32.gmra.mrb[2].mxu0 %vm136_vm0, %v83_v62  ;;  %721 = vperm.xlu0 %1254, %v711_v1  }
  0x49   :  { %1075 = vmatprep.mubr.msk.f32.mxu0 %vm136_vm0, %v84_v0 }
  0x4a   :  { %675 = vperm.xlu1 %1255, %v618_v3  }
  0x4c   :  { %1076 = vmatmul.mubr.msk.f32.gmra.mrb[4].mxu0 %vm136_vm0, %v85_v2  ;;  %694 = vperm.xlu0 %1254, %v621_v5  }
  0x4d   :  { %1078 = vmatprep.mubr.msk.f32.mxu0 %vm136_vm0, %v86_v4 }
  0x4e   :  { %726 = vperm.xlu1 %1255, %v712_v7  }
  0x50   :  { %1079 = vmatmul.mubr.msk.f32.gmra.mrb[6].mxu0 %vm136_vm0, %v87_v6  ;;  %699 = vperm.xlu0 %1254, %v622_v8  }
  0x52   :  { %731 = vperm.xlu1 %1255, %v713_v9  }
  0x54   :  { %894 = vperm.xlu0 %1254, %v888_v10  }
  0x56   :  { %899 = vperm.xlu1 %1255, %v889_v11  }
  0x58   :  { %904 = vperm.xlu0 %1254, %v890_v12  }
  0x5a   :  { %909 = vperm.xlu1 %1255, %v891_v13  }
  0x83   :  { %v99_v15 = vpop.permute.xlu0 %98 }
  0x85   :  { %v109_v16 = vpop.permute.xlu1 %108 }
  0x87   :  { %v104_v17 = vpop.permute.xlu0 %103 }
  0x89   :  { %v114_v22 = vpop.permute.xlu1 %113 }
  0x8b   :  { %v119_v27 = vpop.permute.xlu0 %118 }
  0x8d   :  { %v124_v31 = vpop.permute.xlu1 %123 }
  0x8f   :  { %v129_v38 = vpop.permute.xlu0 %128 }
  0x91   :  { %v134_v42 = vpop.permute.xlu1 %133 }
  0x93   :  { %v388_v1 = vpop.permute.xlu0 %387 }
  0x95   :  { %v393_v4 = vpop.permute.xlu1 %392 }
  0x97   :  { %v436_v9 = vpop.permute.xlu0 %435 }
  0x99   :  { %v441_v12 = vpop.permute.xlu1 %440 }
 0x117   :  { %v1071_v18 = vpop.f32.mrb[0].mxu0 }
 0x118   :  { %v281_v19 = vadd.f32 %v1071_v18, %v104_v17  ;;  %v275_v20 = vpop.f32.mrb[1].mxu0  ;;  %v403_v18 = vpop.permute.xlu1 %402 }
 0x119   :  { %v276_v21 = vadd.f32 %v275_v20, %v99_v15 }
 0x11b   :  { %v330_v23 = vadd.f32 %v281_v19, %v276_v21  ;;  %v1074_v24 = vpop.f32.mrb[2].mxu0 }
 0x11c   :  { %v285_v25 = vpop.f32.mrb[3].mxu0  ;;  %v291_v28 = vadd.f32 %v1074_v24, %v114_v22 }
 0x11d   :  { %v286_v26 = vadd.f32 %v285_v25, %v109_v16  ;;  %v398_v16 = vpop.permute.xlu0 %397 }
 0x11f   :  { %v331_v29 = vadd.f32 %v330_v23, %v286_v26  ;;  %v1077_v30 = vpop.f32.mrb[4].mxu0  ;;  %v451_v23 = vpop.permute.xlu1 %450 }
 0x120   :  { %v295_v32 = vpop.f32.mrb[5].mxu0  ;;  %v301_v35 = vadd.f32 %v1077_v30, %v124_v31 }
 0x121   :  { %v296_v33 = vadd.f32 %v295_v32, %v119_v27  ;;  %v332_v34 = vadd.f32 %v331_v29, %v291_v28 }
 0x123   :  { %v333_v36 = vadd.f32 %v332_v34, %v296_v33  ;;  %v1080_v37 = vpop.f32.mrb[6].mxu0 }
 0x124   :  { %v305_v39 = vpop.f32.mrb[7].mxu0  ;;  %v311_v43 = vadd.f32 %v1080_v37, %v134_v42 }
 0x125   :  { %v306_v40 = vadd.f32 %v305_v39, %v129_v38  ;;  %v334_v41 = vadd.f32 %v333_v36, %v301_v35 }
 0x127   :  { %v335_v44 = vadd.f32 %v334_v41, %v306_v40 }
 0x129   :  { %v336_v45 = vadd.f32 %v335_v44, %v311_v43 }
 0x12b   :  { %v337_v46 = vrot.slane %v336_v45, 4 }
 0x12d   :  { %v338_v47 = vadd.f32 %v337_v46, %v336_v45 }
 0x12f   :  { %v339_v48 = vrot.slane %v338_v47, 2 }
 0x131   :  { %v340_v49 = vadd.f32 %v339_v48, %v338_v47 }
 0x133   :  { %v341_v50 = vrot.slane %v340_v49, 1 }
 0x135   :  { %v342_v51 = vadd.f32 %v341_v50, %v340_v49 }
 0x137   :  { %v344_v52 = vmul.f32 0.015625, %v342_v51 }
 0x139   :  { %v345_v53 = vsub.f32 %v276_v21, %v344_v52  ;;  %v346_v54 = vsub.f32 %v281_v19, %v344_v52  ;;  %v347_v55 = vsub.f32 %v286_v26, %v344_v52  ;;  %v348_v56 = vsub.f32 %v291_v28, %v344_v52  ;;  %v446_v21 = vpop.permute.xlu0 %445  ;;  %v413_v28 = vpop.permute.xlu1 %412 }
 0x13a   :  { %v349_v57 = vsub.f32 %v296_v33, %v344_v52  ;;  %v350_v58 = vsub.f32 %v301_v35, %v344_v52  ;;  %v351_v59 = vsub.f32 %v306_v40, %v344_v52  ;;  %v352_v60 = vsub.f32 %v311_v43, %v344_v52 }
 0x13b   :  { %v353_v61 = vmul.f32 %v345_v53, %v345_v53  ;;  %v354_v62 = vmul.f32 %v346_v54, %v346_v54  ;;  %v355_v63 = vmul.f32 %v347_v55, %v347_v55  ;;  %v356_v2 = vmul.f32 %v348_v56, %v348_v56 }
 0x13c   :  { %v357_v5 = vmul.f32 %v349_v57, %v349_v57  ;;  %v358_v7 = vmul.f32 %v350_v58, %v350_v58  ;;  %v359_v10 = vmul.f32 %v351_v59, %v351_v59  ;;  %v360_v13 = vmul.f32 %v352_v60, %v352_v60 }
 0x13d   :  { %v361_v0 = vadd.f32 %v354_v62, %v353_v61  ;;  %v408_v26 = vpop.permute.xlu0 %407  ;;  %v461_v31 = vpop.permute.xlu1 %460 }
 0x13f   :  { %v362_v3 = vadd.f32 %v361_v0, %v355_v63 }
 0x141   :  { %v363_v6 = vadd.f32 %v362_v3, %v356_v2  ;;  %v456_v30 = vpop.permute.xlu0 %455  ;;  %v423_v33 = vpop.permute.xlu1 %422 }
 0x143   :  { %v364_v8 = vadd.f32 %v363_v6, %v357_v5 }
 0x145   :  { %v365_v11 = vadd.f32 %v364_v8, %v358_v7  ;;  %v418_v32 = vpop.permute.xlu0 %417  ;;  %v471_v52 = vpop.permute.xlu1 %470 }
 0x147   :  { %v366_v14 = vadd.f32 %v365_v11, %v359_v10  ;;  %v65_v10 = vld [vmem:[%s1721_s1 + $0x8] sm:$0xff] }
 0x149   :  { %v367_v15 = vadd.f32 %v366_v14, %v360_v13  ;;  %v466_v47 = vpop.permute.xlu0 %465  ;;  %v490_v13 = vld [vmem:[%s1720_s6 + $0x8] sm:$0xff]  ;;  %v491_v14 = vld [vmem:[%s1720_s6 + $0x10] sm:$0xff] }
 0x14b   :  { %v368_v17 = vrot.slane %v367_v15, 4 }
 0x14d   :  { %v369_v19 = vadd.f32 %v368_v17, %v367_v15  ;;  %v66_v15 = vld [vmem:[%s1721_s1 + $0x10] sm:$0xff]  ;;  %v492_v17 = vld [vmem:[%s1720_s6 + $0x18] sm:$0xff] }
 0x14f   :  { %v370_v20 = vrot.slane %v369_v19, 2 }
 0x151   :  { %v371_v22 = vadd.f32 %v370_v20, %v369_v19  ;;  %v68_v20 = vld [vmem:[%s1721_s1 + $0x20] sm:$0xff] }
 0x153   :  { %v372_v24 = vrot.slane %v371_v22, 1 }
 0x155   :  { %v373_v25 = vadd.f32 %v372_v24, %v371_v22  ;;  %v71_v24 = vld [vmem:[%s1721_s1 + $0x38] sm:$0xff] }
 0x157   :  { %v374_v27 = vmul.f32 0.015625, %v373_v25 }
 0x159   :  { %v375_v29 = vadd.f32 1e-05, %v374_v27  ;;  %v73_v27 = vld [vmem:[%s1721_s1 + $0x48] sm:$0xff] }
 0x15b   :  { %1256 = vrsqrt.f32 %v375_v29  ;;  %v74_v29 = vld [vmem:[%s1721_s1 + $0x50] sm:$0xff] }
 0x165   :  { %v1257_v34 = vpop.eup %1256 }
 0x166   :  { %v383_v35 = vmul.f32 %v1257_v34, %v351_v59  ;;  %v377_v36 = vmul.f32 %v1257_v34, %v345_v53  ;;  %v378_v37 = vmul.f32 %v1257_v34, %v346_v54  ;;  %v379_v38 = vmul.f32 %v1257_v34, %v347_v55 }
 0x167   :  { %v380_v39 = vmul.f32 %v1257_v34, %v348_v56  ;;  %v381_v40 = vmul.f32 %v1257_v34, %v349_v57  ;;  %v382_v41 = vmul.f32 %v1257_v34, %v350_v58  ;;  %v384_v42 = vmul.f32 %v1257_v34, %v352_v60 }
 0x168   :  { %v431_v43 = vmul.f32 %v418_v32, %v383_v35  ;;  %v425_v44 = vmul.f32 %v388_v1, %v377_v36  ;;  %v426_v45 = vmul.f32 %v393_v4, %v378_v37  ;;  %v427_v46 = vmul.f32 %v398_v16, %v379_v38  ;;  %v67_v16 = vld [vmem:[%s1721_s1 + $0x18] sm:$0xff]  ;;  %v76_v32 = vld [vmem:[%s1721_s1 + $0x60] sm:$0xff]  ;;  %v78_v35 = vld [vmem:[%s1721_s1 + $0x70] sm:$0xff] }
 0x169   :  { %v428_v48 = vmul.f32 %v403_v18, %v380_v39  ;;  %v429_v49 = vmul.f32 %v408_v26, %v381_v40  ;;  %v430_v50 = vmul.f32 %v413_v28, %v382_v41  ;;  %v432_v51 = vmul.f32 %v423_v33, %v384_v42  ;;  %v706_v18 = vld [vmem:[%s1722_s10] sm:$0xff]  ;;  %v77_v33 = vld [vmem:[%s1721_s1 + $0x68] sm:$0xff]  ;;  %v79_v36 = vld [vmem:[%s1721_s1 + $0x78] sm:$0xff]  ;;  %v500_v41 = vpop.permute.xlu0 %499  ;;  %v505_v42 = vpop.permute.xlu1 %504 }
 0x16a   :  { %v473_v61 = vadd.f32 %v436_v9, %v425_v44  ;;  %v474_v62 = vadd.f32 %v441_v12, %v426_v45  ;;  %v475_v59 = vadd.f32 %v446_v21, %v427_v46  ;;  %v479_v53 = vadd.f32 %v466_v47, %v431_v43  ;;  %v64_v9 = vld [vmem:[%s1721_s1] sm:$0xff]  ;;  %v69_v21 = vld [vmem:[%s1721_s1 + $0x28] sm:$0xff]  ;;  %v708_v39 = vld [vmem:[%s1722_s10 + $0x10] sm:$0xff] }
 0x16b   :  { %v476_v54 = vadd.f32 %v451_v23, %v428_v48  ;;  %v477_v55 = vadd.f32 %v456_v30, %v429_v49  ;;  %v478_v56 = vadd.f32 %v461_v31, %v430_v50  ;;  %v480_v57 = vadd.f32 %v471_v52, %v432_v51  ;;  %v70_v23 = vld [vmem:[%s1721_s1 + $0x30] sm:$0xff]  ;;  %v72_v26 = vld [vmem:[%s1721_s1 + $0x40] sm:$0xff]  ;;  %v75_v30 = vld [vmem:[%s1721_s1 + $0x58] sm:$0xff] }
 0x16c   :  { %v481_v58 = vmax.f32 %v473_v61, 0.0  ;;  %v482_v60 = vmax.f32 %v474_v62, 0.0  ;;  %v483_v63 = vmax.f32 %v475_v59, 0.0  ;;  %v487_v0 = vmax.f32 %v479_v53, 0.0  ;;  %v707_v38 = vld [vmem:[%s1722_s10 + $0x8] sm:$0xff]  ;;  %v709_v40 = vld [vmem:[%s1722_s10 + $0x18] sm:$0xff] }
 0x16d   :  { %v484_v1 = vmax.f32 %v476_v54, 0.0  ;;  %v485_v2 = vmax.f32 %v477_v55, 0.0  ;;  %v486_v3 = vmax.f32 %v478_v56, 0.0  ;;  %v488_v4 = vmax.f32 %v480_v57, 0.0  ;;  %v510_v49 = vpop.permute.xlu0 %509  ;;  %v515_v52 = vpop.permute.xlu1 %514 }
 0x16e   :  { %v1189_v5 = vpack.c.bf16 %v482_v60, %v481_v58  ;;  %v1205_v11 = vpack.c.bf16 %v65_v10, %v64_v9  ;;  %v1211_v19 = vpack.c.bf16 %v67_v16, %v66_v15  ;;  %v1217_v22 = vpack.c.bf16 %v69_v21, %v68_v20 }
 0x16f   :  { %v1193_v6 = vpack.c.bf16 %v484_v1, %v483_v63  ;;  %v1197_v7 = vpack.c.bf16 %v486_v3, %v485_v2  ;;  %v1201_v8 = vpack.c.bf16 %v488_v4, %v487_v0  ;;  %v1223_v25 = vpack.c.bf16 %v71_v24, %v70_v23 }
 0x170   :  { %1190 = vmatprep.subr.bf16.mxu1 %v1189_v5  ;;  %v1229_v28 = vpack.c.bf16 %v73_v27, %v72_v26  ;;  %v1235_v31 = vpack.c.bf16 %v75_v30, %v74_v29  ;;  %v1241_v34 = vpack.c.bf16 %v77_v33, %v76_v32  ;;  %v1247_v37 = vpack.c.bf16 %v79_v36, %v78_v35 }
 0x171   :  { %1192 = vmatpush3.bf16.msra.mxu1 %v1189_v5 }
 0x172   :  { %1194 = vmatprep.subr.bf16.mxu1 %v1193_v6 }
 0x175   :  { %1196 = vmatpush3.bf16.msra.mxu1 %v1193_v6 }
 0x176   :  { %1198 = vmatprep.subr.bf16.mxu1 %v1197_v7 }
 0x179   :  { %1200 = vmatpush3.bf16.msra.mxu1 %v1197_v7 }
 0x17a   :  { %1202 = vmatprep.subr.bf16.mxu1 %v1201_v8 }
 0x17d   :  { %1204 = vmatpush3.bf16.msra.mxu1 %v1201_v8 }
 0x17e   :  { %1207 = vmatprep.subr.msk.bf16.mxu1 %vm1598_vm4, %v1205_v11 }
 0x180   :  { %1098 = vmatmul.mubr.msk.f32.vlgmr.msra.gmra.mrb[0].mxu1 %vm517_vm2, %v490_v13  ;;  %v666_v13 = vpop.permute.xlu1 %665 }
 0x181   :  { %1100 = vmatprep.mubr.msk.f32.mxu1 %vm517_vm2, %v491_v14 }
 0x184   :  { %1101 = vmatmul.mubr.msk.f32.gmra.mrb[2].mxu1 %vm517_vm2, %v492_v17 }
 0x185   :  { %1135 = vmatprep.mubr.msk.f32.mxu1 %vm734_vm3, %v706_v18  ;;  %v685_v18 = vpop.permute.xlu1 %684 }
 0x186   :  { %1210 = vmatpush3.bf16.xpose.msk.msra.mxu1 %vm1598_vm4, %v1205_v11  ;;  %v661_v11 = vpop.permute.xlu0 %660 }
 0x187   :  { %1213 = vmatprep.subr.msk.bf16.mxu1 %vm1598_vm4, %v1211_v19 }
 0x189   :  { %v717_v23 = vpop.permute.xlu1 %716 }
 0x18a   :  { %v671_v16 = vpop.permute.xlu0 %670 }
 0x18e   :  { %1216 = vmatpush3.bf16.xpose.msk.msra.mxu1 %vm1598_vm4, %v1211_v19  ;;  %v690_v21 = vpop.permute.xlu0 %689 }
 0x18f   :  { %1219 = vmatprep.subr.msk.bf16.mxu1 %vm1598_vm4, %v1217_v22 }
 0x192   :  { %v722_v24 = vpop.permute.xlu0 %721 }
 0x196   :  { %1222 = vmatpush3.bf16.xpose.msk.msra.mxu1 %vm1598_vm4, %v1217_v22  ;;  %v695_v27 = vpop.permute.xlu0 %694 }
 0x197   :  { %1225 = vmatprep.subr.msk.bf16.mxu1 %vm1598_vm4, %v1223_v25 }
 0x19a   :  { %v700_v35 = vpop.permute.xlu0 %699 }
 0x19e   :  { %1228 = vmatpush3.bf16.xpose.msk.msra.mxu1 %vm1598_vm4, %v1223_v25  ;;  %v676_v25 = vpop.permute.xlu1 %675 }
 0x19f   :  { %1231 = vmatprep.subr.msk.bf16.mxu1 %vm1598_vm4, %v1229_v28 }
 0x1a6   :  { %1234 = vmatpush3.bf16.xpose.msk.msra.mxu1 %vm1598_vm4, %v1229_v28  ;;  %v727_v28 = vpop.permute.xlu1 %726 }
 0x1a7   :  { %1237 = vmatprep.subr.msk.bf16.mxu1 %vm1598_vm4, %v1235_v31 }
 0x1aa   :  { %v732_v36 = vpop.permute.xlu1 %731 }
 0x1ae   :  { %1240 = vmatpush3.bf16.xpose.msk.msra.mxu1 %vm1598_vm4, %v1235_v31 }
 0x1af   :  { %1243 = vmatprep.subr.msk.bf16.mxu1 %vm1598_vm4, %v1241_v34 }
 0x1b6   :  { %1246 = vmatpush3.bf16.xpose.msk.msra.mxu1 %vm1598_vm4, %v1241_v34 }
 0x1b7   :  { %1249 = vmatprep.subr.msk.bf16.mxu1 %vm1598_vm4, %v1247_v37 }
 0x1be   :  { %1252 = vmatpush3.bf16.xpose.msk.msra.mxu1 %vm1598_vm4, %v1247_v37 }
 0x1c5   :  { %1136 = vmatmul.mubr.msk.f32.vlgmr.msra.gmra.mrb[4].mxu1 %vm734_vm3, %v707_v38 }
 0x1c6   :  { %1138 = vmatprep.mubr.msk.f32.mxu1 %vm734_vm3, %v708_v39 }
 0x1c9   :  { %1139 = vmatmul.mubr.msk.f32.gmra.mrb[6].mxu1 %vm734_vm3, %v709_v40 }
 0x253   :  { %v1099_v43 = vpop.f32.mrb[0].mxu1 }
 0x254   :  { %v602_v44 = vadd.f32 %v1099_v43, %v505_v42  ;;  %v596_v45 = vpop.f32.mrb[1].mxu1 }
 0x255   :  { %v597_v46 = vadd.f32 %v596_v45, %v500_v41 }
 0x257   :  { %v623_v47 = vadd.f32 %v602_v44, %v597_v46  ;;  %v1102_v48 = vpop.f32.mrb[2].mxu1 }
 0x258   :  { %v606_v50 = vpop.f32.mrb[3].mxu1  ;;  %v612_v61 = vadd.f32 %v1102_v48, %v515_v52  ;;  %v895_v48 = vpop.permute.xlu0 %894 }
 0x259   :  { %v607_v51 = vadd.f32 %v606_v50, %v510_v49 }
 0x25b   :  { %v624_v62 = vadd.f32 %v623_v47, %v607_v51 }
 0x25d   :  { %v625_v59 = vadd.f32 %v624_v62, %v612_v61 }
 0x25f   :  { %v626_v53 = vrot.slane %v625_v59, 4 }
 0x261   :  { %v627_v54 = vadd.f32 %v626_v53, %v625_v59 }
 0x263   :  { %v628_v55 = vrot.slane %v627_v54, 2 }
 0x265   :  { %v629_v56 = vadd.f32 %v628_v55, %v627_v54 }
 0x267   :  { %v630_v57 = vrot.slane %v629_v56, 1 }
 0x269   :  { %v631_v58 = vadd.f32 %v630_v57, %v629_v56 }
 0x26b   :  { %v633_v60 = vmul.f32 0.03125, %v631_v58 }
 0x26d   :  { %v634_v63 = vsub.f32 %v597_v46, %v633_v60  ;;  %v635_v0 = vsub.f32 %v602_v44, %v633_v60  ;;  %v636_v1 = vsub.f32 %v607_v51, %v633_v60  ;;  %v637_v2 = vsub.f32 %v612_v61, %v633_v60  ;;  %v900_v61 = vpop.permute.xlu1 %899 }
 0x26f   :  { %v638_v3 = vmul.f32 %v634_v63, %v634_v63  ;;  %v639_v4 = vmul.f32 %v635_v0, %v635_v0  ;;  %v640_v5 = vmul.f32 %v636_v1, %v636_v1  ;;  %v641_v7 = vmul.f32 %v637_v2, %v637_v2 }
 0x271   :  { %v642_v6 = vadd.f32 %v639_v4, %v638_v3 }
 0x273   :  { %v643_v8 = vadd.f32 %v642_v6, %v640_v5 }
 0x275   :  { %v644_v9 = vadd.f32 %v643_v8, %v641_v7 }
 0x277   :  { %v645_v10 = vrot.slane %v644_v9, 4 }
 0x279   :  { %v646_v12 = vadd.f32 %v645_v10, %v644_v9 }
 0x27b   :  { %v647_v14 = vrot.slane %v646_v12, 2 }
 0x27d   :  { %v648_v15 = vadd.f32 %v647_v14, %v646_v12 }
 0x27f   :  { %v649_v17 = vrot.slane %v648_v15, 1 }
 0x281   :  { %v650_v19 = vadd.f32 %v649_v17, %v648_v15 }
 0x283   :  { %v651_v20 = vmul.f32 0.03125, %v650_v19 }
 0x285   :  { %v652_v22 = vadd.f32 1e-05, %v651_v20 }
 0x287   :  { %1258 = vrsqrt.f32 %v652_v22 }
 0x291   :  { %v1259_v26 = vpop.eup %1258 }
 0x292   :  { %v656_v29 = vmul.f32 %v1259_v26, %v636_v1  ;;  %v655_v30 = vmul.f32 %v1259_v26, %v635_v0  ;;  %v654_v31 = vmul.f32 %v1259_v26, %v634_v63  ;;  %v657_v32 = vmul.f32 %v1259_v26, %v637_v2  ;;  %v905_v0 = vpop.permute.xlu0 %904  ;;  %v910_v2 = vpop.permute.xlu1 %909 }
 0x294   :  { %v679_v33 = vmul.f32 %v666_v13, %v655_v30  ;;  %v678_v34 = vmul.f32 %v661_v11, %v654_v31  ;;  %v681_v41 = vmul.f32 %v676_v25, %v657_v32  ;;  %v680_v44 = vmul.f32 %v671_v16, %v656_v29 }
 0x295   :  { %v926_v11 = vstv %s1723_s13 }
 0x296   :  { %v703_v38 = vadd.f32 %v690_v21, %v679_v33  ;;  %v702_v42 = vadd.f32 %v685_v18, %v678_v34  ;;  %v705_v50 = vadd.f32 %v700_v35, %v681_v41  ;;  %v704_v59 = vadd.f32 %v695_v27, %v680_v44 }
 0x298   :  { %v1137_v37 = vpop.f32.mrb[4].mxu1 }
 0x299   :  { %v867_v39 = vadd.f32 %v1137_v37, %v722_v24  ;;  %v861_v40 = vpop.f32.mrb[5].mxu1 }
 0x29a   :  { %v862_v43 = vadd.f32 %v861_v40, %v717_v23 }
 0x29b   :  { %v881_v45 = vadd.f32 %v867_v39, %v703_v38 }
 0x29c   :  { %v880_v46 = vadd.f32 %v862_v43, %v702_v42  ;;  %v1140_v47 = vpop.f32.mrb[6].mxu1 }
 0x29d   :  { %v885_v49 = vmax.f32 %v881_v45, 0.0  ;;  %v877_v51 = vadd.f32 %v1140_v47, %v732_v36  ;;  %v871_v52 = vpop.f32.mrb[7].mxu1 }
 0x29e   :  { %v884_v62 = vmax.f32 %v880_v46, 0.0  ;;  %v872_v53 = vadd.f32 %v871_v52, %v727_v28 }
 0x29f   :  { %v913_v54 = vmul.f32 %v900_v61, %v885_v49  ;;  %v883_v55 = vadd.f32 %v877_v51, %v705_v50 }
 0x2a0   :  { %v912_v56 = vmul.f32 %v895_v48, %v884_v62  ;;  %v882_v57 = vadd.f32 %v872_v53, %v704_v59 }
 0x2a1   :  { %v887_v60 = vmax.f32 %v883_v55, 0.0 }
 0x2a2   :  { %v916_v58 = vadd.f32 %v913_v54, %v912_v56  ;;  %v886_v63 = vmax.f32 %v882_v57, 0.0 }
 0x2a3   :  { %v915_v3 = vmul.f32 %v910_v2, %v887_v60 }
 0x2a4   :  { %v914_v1 = vmul.f32 %v905_v0, %v886_v63 }
 0x2a6   :  { %v917_v4 = vadd.f32 %v916_v58, %v914_v1 }
 0x2a8   :  { %v918_v5 = vadd.f32 %v917_v4, %v915_v3 }
 0x2aa   :  { %v919_v6 = vrot.slane %v918_v5, 4 }
 0x2ac   :  { %v920_v7 = vadd.f32 %v919_v6, %v918_v5 }
 0x2ae   :  { %v921_v8 = vrot.slane %v920_v7, 2 }
 0x2b0   :  { %v922_v9 = vadd.f32 %v921_v8, %v920_v7 }
 0x2b2   :  { %v923_v10 = vrot.slane %v922_v9, 1 }
 0x2b4   :  { %v924_v12 = vadd.f32 %v923_v10, %v922_v9 }
 0x2b6   :  { %v927_v13 = vadd.f32 %v926_v11, %v924_v12 }
 0x2b8   :  { %928 = vst [vmem:[%s1724_s14] sm:$0x1] %v927_v13 }

</bundles_post_ra>
